<compile_context>
chip_gen: v7x
topology: tpu7x:2x2x1
jax: 0.10.0
libtpu: 0.0.40
codegen_flags: <defaults>
</compile_context>

<pallas_src>
import jax
import jax.numpy as jnp
from jax.experimental import pallas as pl
from jax.experimental.pallas import tpu as pltpu


def _round_up(a, b):
    return (a + b - 1) // b * b


def set_encoder_kernel(
    x_ref,                     # (M, R, F)  f32, raw (may contain NaN)
    phi_w1_ref, phi_b1_ref,    # (F, 2D), (1, 2D)
    phi_w2_ref, phi_b2_ref,    # (2D, D), (1, D)
    rho_w1_ref, rho_b1_ref,    # (D, 2D), (1, 2D)
    rho_w2_ref, rho_b2_ref,    # (2D, D), (1, D)
    y_ref,                     # (R, D)
):
    M, R, F = x_ref.shape
    D = y_ref.shape[-1]

    # One big phi matmul over every (set-element, row) pair: M*R rows.
    x = x_ref[...].reshape(M * R, F)
    f0 = x[:, 0:1]
    exists = (f0 == f0)                      # NaN != NaN  ->  vehicle missing
    exists_f = exists.astype(jnp.float32)    # (M*R, 1)
    x0 = jnp.where(exists, x, 0.0)

    h = jnp.maximum(
        jnp.dot(x0, phi_w1_ref[...], preferred_element_type=jnp.float32)
        + phi_b1_ref[...], 0.0)
    h = (jnp.dot(h, phi_w2_ref[...], preferred_element_type=jnp.float32)
         + phi_b2_ref[...]) * exists_f       # (M*R, D)

    # Set sum over M: leading-axis adds (VPU), no membership matmul.
    sum_h = h.reshape(M, R, D).sum(axis=0)   # (R, D)

    g = jnp.maximum(
        jnp.dot(sum_h, rho_w1_ref[...], preferred_element_type=jnp.float32)
        + rho_b1_ref[...], 0.0)
    y_ref[...] = (jnp.dot(g, rho_w2_ref[...], preferred_element_type=jnp.float32)
                  + rho_b2_ref[...])


def _full_spec(shape):
    nd = len(shape)
    return pl.BlockSpec(shape, lambda i, _nd=nd: (0,) * _nd)


@jax.jit
def set_encoder_forward(params, x):
    """x: (N, T, M, F) float32, NaN marks missing vehicles. Returns (N, T, D)."""
    N, T, M, F = x.shape
    D = params['phi_w2'].shape[-1]
    NT = N * T

    # Set-major layout: (M, N*T, F) so the set sum is a leading-axis add.
    xm = jnp.transpose(x, (2, 0, 1, 3)).reshape(M, NT, F)

    # Row tiling: every grid block is full; sublane dim is a multiple of 8.
    row_block = min(_round_up(NT, 8), 512)
    nt_pad = _round_up(NT, row_block)
    if nt_pad != NT:
        xm = jnp.pad(xm, ((0, 0), (0, nt_pad - NT), (0, 0)),
                     constant_values=jnp.nan)   # padded rows -> exists == 0

    weights = (params['phi_w1'], params['phi_b1'],
               params['phi_w2'], params['phi_b2'],
               params['rho_w1'], params['rho_b1'],
               params['rho_w2'], params['rho_b2'])

    y = pl.pallas_call(
        set_encoder_kernel,
        out_shape=jax.ShapeDtypeStruct((nt_pad, D), jnp.float32),
        grid=(nt_pad // row_block,),
        in_specs=[pl.BlockSpec((M, row_block, F), lambda i: (0, i, 0))]
                 + [_full_spec(w.shape) for w in weights],
        out_specs=pl.BlockSpec((row_block, D), lambda i: (i, 0)),
        compiler_params=pltpu.CompilerParams(
            dimension_semantics=("parallel",)),
    )(xm, *weights)

    return y[:NT].reshape(N, T, D)


def make_params(key, f_dim, d_dim):
    """PyTorch nn.Linear default init; weights stored (in_features, out_features)."""
    def lin(k, fan_in, fan_out):
        kw, kb = jax.random.split(k)
        bound = 1.0 / jnp.sqrt(jnp.float32(fan_in))
        w = jax.random.uniform(kw, (fan_in, fan_out), jnp.float32, -bound, bound)
        b = jax.random.uniform(kb, (1, fan_out), jnp.float32, -bound, bound)
        return w, b

    ks = jax.random.split(key, 4)
    p = {}
    p['phi_w1'], p['phi_b1'] = lin(ks[0], f_dim, 2 * d_dim)
    p['phi_w2'], p['phi_b2'] = lin(ks[1], 2 * d_dim, d_dim)
    p['rho_w1'], p['rho_b1'] = lin(ks[2], d_dim, 2 * d_dim)
    p['rho_w2'], p['rho_b2'] = lin(ks[3], 2 * d_dim, d_dim)
    return p


def set_encoder_ref(params, x):
    """Pure-JAX reference mirroring the PyTorch module exactly."""
    exists = ~jnp.isnan(x[..., 0])
    x0 = jnp.where(exists[..., None], x, 0.0)
    h = jnp.maximum(x0 @ params['phi_w1'] + params['phi_b1'], 0.0)
    h = (h @ params['phi_w2'] + params['phi_b2']) * exists[..., None]
    sum_h = h.sum(axis=2)
    g = jnp.maximum(sum_h @ params['rho_w1'] + params['rho_b1'], 0.0)
    return g @ params['rho_w2'] + params['rho_b2']


if __name__ == "__main__":
    key = jax.random.PRNGKey(0)
    N, T, M, F, D = 2, 8, 4, 6, 32
    kx, kp = jax.random.split(key)

    x = jax.random.normal(kx, (N, T, M, F), jnp.float32)
    # vehicle 1 missing for the last two timesteps
    x = x.at[:, T - 2:, 1, :].set(jnp.nan)
    # batch 1, vehicle 3 missing entirely
    x = x.at[1, :, 3, :].set(jnp.nan)

    params = make_params(kp, F, D)

    y = set_encoder_forward(params, x)
    jax.block_until_ready(y)

    y_ref = set_encoder_ref(params, x)

    assert y.shape == (N, T, D)
    assert bool(jnp.all(jnp.isfinite(y)))
    assert bool(jnp.allclose(y, y_ref, atol=2e-2, rtol=2e-2))
    print("KERNEL_OK")
</pallas_src>

<mosaic_0001>
module attributes {stable_mosaic.version = 11 : i64} {
  func.func @set_encoder_kernel(%arg0: i32, %arg1: memref<4x16x6xf32, #tpu.memory_space<vmem>>, %arg2: memref<6x64xf32, #tpu.memory_space<vmem>>, %arg3: memref<1x64xf32, #tpu.memory_space<vmem>>, %arg4: memref<64x32xf32, #tpu.memory_space<vmem>>, %arg5: memref<1x32xf32, #tpu.memory_space<vmem>>, %arg6: memref<32x64xf32, #tpu.memory_space<vmem>>, %arg7: memref<1x64xf32, #tpu.memory_space<vmem>>, %arg8: memref<64x32xf32, #tpu.memory_space<vmem>>, %arg9: memref<1x32xf32, #tpu.memory_space<vmem>>, %arg10: memref<16x32xf32, #tpu.memory_space<vmem>>) attributes {dimension_semantics = [#tpu.dimension_semantics<parallel>], iteration_bounds = array<i64: 1>, scalar_prefetch = 0 : i64, scratch_operands = 0 : i64, tpu.core_type = #tpu.core_type<tc>, window_params = [{transform_indices = @transform_0, window_bounds = array<i64: 4, 16, 6>}, {pipeline_mode = #tpu.pipeline_mode<synchronous>, transform_indices = @transform_1, window_bounds = array<i64: 6, 64>}, {pipeline_mode = #tpu.pipeline_mode<synchronous>, transform_indices = @transform_2, window_bounds = array<i64: 1, 64>}, {pipeline_mode = #tpu.pipeline_mode<synchronous>, transform_indices = @transform_3, window_bounds = array<i64: 64, 32>}, {pipeline_mode = #tpu.pipeline_mode<synchronous>, transform_indices = @transform_4, window_bounds = array<i64: 1, 32>}, {pipeline_mode = #tpu.pipeline_mode<synchronous>, transform_indices = @transform_5, window_bounds = array<i64: 32, 64>}, {pipeline_mode = #tpu.pipeline_mode<synchronous>, transform_indices = @transform_6, window_bounds = array<i64: 1, 64>}, {pipeline_mode = #tpu.pipeline_mode<synchronous>, transform_indices = @transform_7, window_bounds = array<i64: 64, 32>}, {pipeline_mode = #tpu.pipeline_mode<synchronous>, transform_indices = @transform_8, window_bounds = array<i64: 1, 32>}, {transform_indices = @transform_9, window_bounds = array<i64: 16, 32>}]} {
    %c0 = arith.constant 0 : index
    %c0_0 = arith.constant 0 : index
    %c0_1 = arith.constant 0 : index
    %0 = vector.load %arg1[%c0, %c0_0, %c0_1] : memref<4x16x6xf32, #tpu.memory_space<vmem>>, vector<4x16x6xf32>
    %1 = vector.shape_cast %0 : vector<4x16x6xf32> to vector<64x6xf32>
    %2 = vector.extract_strided_slice %1 {offsets = [0, 0], sizes = [64, 1], strides = [1, 1]} : vector<64x6xf32> to vector<64x1xf32>
    %3 = arith.cmpf oeq, %2, %2 : vector<64x1xf32>
    %4 = arith.extui %3 : vector<64x1xi1> to vector<64x1xi32>
    %5 = arith.sitofp %4 : vector<64x1xi32> to vector<64x1xf32>
    %cst = arith.constant 0.000000e+00 : f32
    %6 = vector.shape_cast %3 : vector<64x1xi1> to vector<64x1xi1>
    %7 = vector.broadcast %6 : vector<64x1xi1> to vector<64x6xi1>
    %8 = vector.broadcast %cst : f32 to vector<64x6xf32>
    %9 = arith.select %7, %1, %8 : vector<64x6xi1>, vector<64x6xf32>
    %c0_2 = arith.constant 0 : index
    %c0_3 = arith.constant 0 : index
    %10 = vector.load %arg2[%c0_2, %c0_3] : memref<6x64xf32, #tpu.memory_space<vmem>>, vector<6x64xf32>
    %cst_4 = arith.constant dense<0.000000e+00> : vector<64x64xf32>
    %11 = tpu.matmul %9, %10, %cst_4 {dimension_numbers = #tpu.dot_dimension_numbers<[1], [0], [0], [1], [0, 0, 1, 1], [], []>} : vector<64x6xf32>, vector<6x64xf32>, vector<64x64xf32> -> vector<64x64xf32>
    %c0_5 = arith.constant 0 : index
    %c0_6 = arith.constant 0 : index
    %12 = vector.load %arg3[%c0_5, %c0_6] : memref<1x64xf32, #tpu.memory_space<vmem>>, vector<1x64xf32>
    %13 = vector.broadcast %12 : vector<1x64xf32> to vector<64x64xf32>
    %14 = arith.addf %11, %13 : vector<64x64xf32>
    %cst_7 = arith.constant 0.000000e+00 : f32
    %15 = vector.broadcast %cst_7 : f32 to vector<64x64xf32>
    %16 = arith.maximumf %14, %15 : vector<64x64xf32>
    %c0_8 = arith.constant 0 : index
    %c0_9 = arith.constant 0 : index
    %17 = vector.load %arg4[%c0_8, %c0_9] : memref<64x32xf32, #tpu.memory_space<vmem>>, vector<64x32xf32>
    %cst_10 = arith.constant dense<0.000000e+00> : vector<64x32xf32>
    %18 = tpu.matmul %16, %17, %cst_10 {dimension_numbers = #tpu.dot_dimension_numbers<[1], [0], [0], [1], [0, 0, 1, 1], [], []>} : vector<64x64xf32>, vector<64x32xf32>, vector<64x32xf32> -> vector<64x32xf32>
    %c0_11 = arith.constant 0 : index
    %c0_12 = arith.constant 0 : index
    %19 = vector.load %arg5[%c0_11, %c0_12] : memref<1x32xf32, #tpu.memory_space<vmem>>, vector<1x32xf32>
    %20 = vector.broadcast %19 : vector<1x32xf32> to vector<64x32xf32>
    %21 = arith.addf %18, %20 : vector<64x32xf32>
    %22 = vector.broadcast %5 : vector<64x1xf32> to vector<64x32xf32>
    %23 = arith.mulf %21, %22 : vector<64x32xf32>
    %24 = vector.shape_cast %23 : vector<64x32xf32> to vector<4x16x32xf32>
    %cst_13 = arith.constant dense<0.000000e+00> : vector<16x32xf32>
    %25 = vector.multi_reduction <add>, %24, %cst_13 [0] : vector<4x16x32xf32> to vector<16x32xf32>
    %c0_14 = arith.constant 0 : index
    %c0_15 = arith.constant 0 : index
    %26 = vector.load %arg6[%c0_14, %c0_15] : memref<32x64xf32, #tpu.memory_space<vmem>>, vector<32x64xf32>
    %cst_16 = arith.constant dense<0.000000e+00> : vector<16x64xf32>
    %27 = tpu.matmul %25, %26, %cst_16 {dimension_numbers = #tpu.dot_dimension_numbers<[1], [0], [0], [1], [0, 0, 1, 1], [], []>} : vector<16x32xf32>, vector<32x64xf32>, vector<16x64xf32> -> vector<16x64xf32>
    %c0_17 = arith.constant 0 : index
    %c0_18 = arith.constant 0 : index
    %28 = vector.load %arg7[%c0_17, %c0_18] : memref<1x64xf32, #tpu.memory_space<vmem>>, vector<1x64xf32>
    %29 = vector.broadcast %28 : vector<1x64xf32> to vector<16x64xf32>
    %30 = arith.addf %27, %29 : vector<16x64xf32>
    %cst_19 = arith.constant 0.000000e+00 : f32
    %31 = vector.broadcast %cst_19 : f32 to vector<16x64xf32>
    %32 = arith.maximumf %30, %31 : vector<16x64xf32>
    %c0_20 = arith.constant 0 : index
    %c0_21 = arith.constant 0 : index
    %33 = vector.load %arg8[%c0_20, %c0_21] : memref<64x32xf32, #tpu.memory_space<vmem>>, vector<64x32xf32>
    %cst_22 = arith.constant dense<0.000000e+00> : vector<16x32xf32>
    %34 = tpu.matmul %32, %33, %cst_22 {dimension_numbers = #tpu.dot_dimension_numbers<[1], [0], [0], [1], [0, 0, 1, 1], [], []>} : vector<16x64xf32>, vector<64x32xf32>, vector<16x32xf32> -> vector<16x32xf32>
    %c0_23 = arith.constant 0 : index
    %c0_24 = arith.constant 0 : index
    %35 = vector.load %arg9[%c0_23, %c0_24] : memref<1x32xf32, #tpu.memory_space<vmem>>, vector<1x32xf32>
    %36 = vector.broadcast %35 : vector<1x32xf32> to vector<16x32xf32>
    %37 = arith.addf %34, %36 : vector<16x32xf32>
    %c0_25 = arith.constant 0 : index
    %c0_26 = arith.constant 0 : index
    %38 = vector.load %arg10[%c0_25, %c0_26] : memref<16x32xf32, #tpu.memory_space<vmem>>, vector<16x32xf32>
    tpu.vector_store %arg10[%c0_25, %c0_26], %37 {strides = array<i32>} : memref<16x32xf32, #tpu.memory_space<vmem>>, vector<16x32xf32>,
    return
  }
  func.func @transform_0(%arg0: i32) -> (i32, i32, i32) {
    %c0_i32 = arith.constant 0 : i32
    %c0_i32_0 = arith.constant 0 : i32
    %c0_i32_1 = arith.constant 0 : i32
    return %c0_i32, %arg0, %c0_i32_0 : i32, i32, i32
  }
  func.func @transform_1(%arg0: i32) -> (i32, i32) {
    %c0_i32 = arith.constant 0 : i32
    %c0_i32_0 = arith.constant 0 : i32
    %c0_i32_1 = arith.constant 0 : i32
    return %c0_i32, %c0_i32_0 : i32, i32
  }
  func.func @transform_2(%arg0: i32) -> (i32, i32) {
    %c0_i32 = arith.constant 0 : i32
    %c0_i32_0 = arith.constant 0 : i32
    %c0_i32_1 = arith.constant 0 : i32
    return %c0_i32, %c0_i32_0 : i32, i32
  }
  func.func @transform_3(%arg0: i32) -> (i32, i32) {
    %c0_i32 = arith.constant 0 : i32
    %c0_i32_0 = arith.constant 0 : i32
    %c0_i32_1 = arith.constant 0 : i32
    return %c0_i32, %c0_i32_0 : i32, i32
  }
  func.func @transform_4(%arg0: i32) -> (i32, i32) {
    %c0_i32 = arith.constant 0 : i32
    %c0_i32_0 = arith.constant 0 : i32
    %c0_i32_1 = arith.constant 0 : i32
    return %c0_i32, %c0_i32_0 : i32, i32
  }
  func.func @transform_5(%arg0: i32) -> (i32, i32) {
    %c0_i32 = arith.constant 0 : i32
    %c0_i32_0 = arith.constant 0 : i32
    %c0_i32_1 = arith.constant 0 : i32
    return %c0_i32, %c0_i32_0 : i32, i32
  }
  func.func @transform_6(%arg0: i32) -> (i32, i32) {
    %c0_i32 = arith.constant 0 : i32
    %c0_i32_0 = arith.constant 0 : i32
    %c0_i32_1 = arith.constant 0 : i32
    return %c0_i32, %c0_i32_0 : i32, i32
  }
  func.func @transform_7(%arg0: i32) -> (i32, i32) {
    %c0_i32 = arith.constant 0 : i32
    %c0_i32_0 = arith.constant 0 : i32
    %c0_i32_1 = arith.constant 0 : i32
    return %c0_i32, %c0_i32_0 : i32, i32
  }
  func.func @transform_8(%arg0: i32) -> (i32, i32) {
    %c0_i32 = arith.constant 0 : i32
    %c0_i32_0 = arith.constant 0 : i32
    %c0_i32_1 = arith.constant 0 : i32
    return %c0_i32, %c0_i32_0 : i32, i32
  }
  func.func @transform_9(%arg0: i32) -> (i32, i32) {
    %c0_i32 = arith.constant 0 : i32
    %c0_i32_0 = arith.constant 0 : i32
    return %arg0, %c0_i32 : i32, i32
  }
}

</mosaic_0001>

<bundles_post_ra>
// kernel: set_encoder_forward.1
= control target key start
LH: loop header
LB: loop body
LE: loop exit
PB: predicated region body
PF: predicated region fallthrough
CT: control target
= control target key end

     0   :  { %v908_v3 = vmov 0   ;;  %s1192_s0 = inlined_call_operand.vmem [shape: f32[4,16,6], index: 0, kind: input, shape index: {}]   ;;  %s1193_s1 = inlined_call_operand.vmem [shape: f32[6,64], index: 1, kind: input, shape index: {}]   ;;  %s1194_s2 = inlined_call_operand.vmem [shape: f32[1,64], index: 2, kind: input, shape index: {}]   ;;  %s1195_s3 = inlined_call_operand.vmem [shape: f32[64,32], index: 3, kind: input, shape index: {}]   ;;  %s1196_s4 = inlined_call_operand.vmem [shape: f32[1,32], index: 4, kind: input, shape index: {}]   ;;  %s1197_s5 = inlined_call_operand.vmem [shape: f32[32,64], index: 5, kind: input, shape index: {}]   ;;  %s1198_s6 = inlined_call_operand.vmem [shape: f32[1,64], index: 6, kind: input, shape index: {}]   ;;  %s1199_s7 = inlined_call_operand.vmem [shape: f32[64,32], index: 7, kind: input, shape index: {}]   ;;  %s1200_s8 = inlined_call_operand.vmem [shape: f32[1,32], index: 8, kind: input, shape index: {}]   ;;  %s1201_s9 = inlined_call_operand.hbm [shape: f32[16,32], index: 9, kind: output, shape index: {}]  }
   0x1   :  { %v966_v0 = vld [vmem:[%s1192_s0 + $0x10] sm:$0xff]  ;;  %v971_v1 = vld [vmem:[%s1192_s0] sm:$0xff]  ;;  %v976_v2 = vld [vmem:[%s1192_s0 + $0x18] sm:$0xff]  ;;  %863 = vset.pattern.permute.xlu1 %v908_v3  ;;  %862 = vset.pattern.permute.xlu0 %v908_v3 }
   0x2   :  { %vm43_vm0 = vcmp.eq.f32.partialorder %v966_v0, %v966_v0  ;;  %vm41_vm1 = vcmp.eq.f32.partialorder %v971_v1, %v971_v1  ;;  %vm44_vm2 = vcmp.eq.f32.partialorder %v976_v2, %v976_v2  ;;  %v987_v4 = vld [vmem:[%s1192_s0 + $0x8] sm:$0xff]  ;;  %v1003_v8 = vld [vmem:[%s1192_s0 + $0x20] sm:$0xff] }
   0x3   :  { %v51_v5 = vsel %vm43_vm0, 1, %v908_v3  ;;  %v49_v6 = vsel %vm41_vm1, 1, %v908_v3  ;;  %v998_v7 = vld [vmem:[%s1192_s0 + $0x28] sm:$0xff]  ;;  %vm42_vm3 = vcmp.eq.f32.partialorder %v987_v4, %v987_v4 }
   0x4   :  { %72 = vperm.xlu1 %863, %v51_v5   ;;  %66 = vperm.xlu0 %862, %v49_v6  }
   0x5   :  { %14 = vsyncpa [#allocation3], 0  ;;  %v52_v9 = vsel %vm44_vm2, 1, %v908_v3  ;;  %v50_v10 = vsel %vm42_vm3, 1, %v908_v3  ;;  %vm46_vm4 = vcmp.eq.f32.partialorder %v998_v7, %v998_v7  ;;  %vm45_vm5 = vcmp.eq.f32.partialorder %v1003_v8, %v1003_v8  ;;  %v1020_v11 = vld [vmem:[%s1192_s0 + $0x38] sm:$0xff]  ;;  %v1025_v12 = vld [vmem:[%s1192_s0 + $0x30] sm:$0xff] }
   0x6   :  { %v105_v13 = vld [vmem:[%s1193_s1] sm:$0x3f]  ;;  %v54_v14 = vsel %vm46_vm4, 1, %v908_v3  ;;  %v53_v15 = vsel %vm45_vm5, 1, %v908_v3  ;;  %vm138_vm6 = vcmask 1045504   ;;  %vm48_vm7 = vcmp.eq.f32.partialorder %v1020_v11, %v1020_v11  ;;  %v256_v32 = vld [vmem:[%s1195_s3 + $0x8] sm:$0xff] }
   0x7   :  { %vm47_vm8 = vcmp.eq.f32.partialorder %v1025_v12, %v1025_v12  ;;  %745 = vmatprep.subr.msk.mxu0 %vm138_vm6, %v105_v13  ;;  %v909_v16 = vmov 0.0   ;;  %v56_v21 = vsel %vm48_vm7, 1, %v908_v3  ;;  %v255_v31 = vld [vmem:[%s1195_s3] sm:$0xff]  ;;  %v257_v33 = vld [vmem:[%s1195_s3 + $0x10] sm:$0xff]  ;;  %v258_v35 = vld [vmem:[%s1195_s3 + $0x18] sm:$0xff]  ;;  %vm113_vm9 = vcmask 48128  }
   0x8   :  { %75 = vperm.xlu1 %863, %v52_v9   ;;  %69 = vperm.xlu0 %862, %v50_v10   ;;  %v673_v17 = vsel %vm43_vm0, 1.0, %v909_v16  ;;  %v671_v18 = vsel %vm41_vm1, 1.0, %v909_v16  ;;  %v674_v19 = vsel %vm44_vm2, 1.0, %v909_v16  ;;  %v672_v20 = vsel %vm42_vm3, 1.0, %v909_v16  ;;  %v259_v37 = vld [vmem:[%s1195_s3 + $0x20] sm:$0xff]  ;;  %v260_v38 = vld [vmem:[%s1195_s3 + $0x28] sm:$0xff] }
   0x9   :  { %746 = vmatpush3.msk.msra.mxu0 %vm138_vm6, %v105_v13  ;;  %v55_v22 = vsel %vm47_vm8, 1, %v908_v3  ;;  %v864_v23 = vpack.i.bf16 %v673_v17, %v671_v18  ;;  %v869_v24 = vpack.i.bf16 %v674_v19, %v672_v20  ;;  %v676_v25 = vsel %vm46_vm4, 1.0, %v909_v16  ;;  %v261_v56 = vld [vmem:[%s1195_s3 + $0x30] sm:$0xff]  ;;  %v262_v57 = vld [vmem:[%s1195_s3 + $0x38] sm:$0xff]  ;;  %v679_v59 = vld [vmem:[%s1194_s2] ss:$0 sm:$0xff] }
   0xa   :  { %v675_v26 = vsel %vm45_vm5, 1.0, %v909_v16  ;;  %v678_v27 = vsel %vm48_vm7, 1.0, %v909_v16  ;;  %v677_v28 = vsel %vm47_vm8, 1.0, %v909_v16  ;;  %v817_v34 = vpack.c.bf16 %v256_v32, %v255_v31  ;;  %v463_v20 = vld [vmem:[%s1197_s5] sm:$0xff] }
   0xb   :  { %v879_v29 = vpack.i.bf16 %v678_v27, %v677_v28  ;;  %v874_v30 = vpack.i.bf16 %v676_v25, %v675_v26  ;;  %v821_v36 = vpack.c.bf16 %v258_v35, %v257_v33  ;;  %v825_v39 = vpack.c.bf16 %v260_v38, %v259_v37  ;;  %v557_v26 = vld [vmem:[%s1199_s7] sm:$0xff]  ;;  %v558_v27 = vld [vmem:[%s1199_s7 + $0x8] sm:$0xff]  ;;  %v559_v28 = vld [vmem:[%s1199_s7 + $0x10] sm:$0xff] }
   0xc   :  { %81 = vperm.xlu1 %863, %v54_v14   ;;  %78 = vperm.xlu0 %862, %v53_v15   ;;  %v829_v58 = vpack.c.bf16 %v262_v57, %v261_v56  ;;  %vm270_vm2 = vcmask 523264   ;;  %v561_v32 = vld [vmem:[%s1199_s7 + $0x20] sm:$0xff]  ;;  %v562_v33 = vld [vmem:[%s1199_s7 + $0x28] sm:$0xff]  ;;  %vm448_vm3 = vcmask 261120  }
   0xd   :  { %818 = vmatprep.subr.bf16.mxu1 %v817_v34  ;;  %v689_v35 = vld [vmem:[%s1196_s4] ss:$0 sm:$0xff] }
   0xe   :  { %820 = vmatpush3.bf16.msra.mxu1 %v817_v34  ;;  %v849_v34 = vpack.c.bf16 %v562_v33, %v561_v32  ;;  %v701_v32 = vld [vmem:[%s1200_s8] ss:$0 sm:$0xff] }
   0xf   :  { %822 = vmatprep.subr.bf16.mxu1 %v821_v36 }
  0x10   :  { %87 = vperm.xlu1 %863, %v56_v21   ;;  %84 = vperm.xlu0 %862, %v55_v22   ;;  %v464_v21 = vld [vmem:[%s1197_s5 + $0x8] sm:$0xff] }
  0x11   :  { %v833_v22 = vpack.c.bf16 %v464_v21, %v463_v20 }
  0x12   :  { %824 = vmatpush3.bf16.msra.mxu1 %v821_v36 }
  0x13   :  { %826 = vmatprep.subr.bf16.mxu1 %v825_v39  ;;  %834 = vmatprep.subr.bf16.mxu0 %v833_v22 }
  0x14   :  { %870 = vperm.xlu1 %863, %v869_v24   ;;  %865 = vperm.xlu0 %862, %v864_v23   ;;  %v465_v23 = vld [vmem:[%s1197_s5 + $0x10] sm:$0xff]  ;;  %v466_v24 = vld [vmem:[%s1197_s5 + $0x18] sm:$0xff] }
  0x15   :  { %v837_v25 = vpack.c.bf16 %v466_v24, %v465_v23  ;;  %v564_v23 = vld [vmem:[%s1199_s7 + $0x38] sm:$0xff] }
  0x16   :  { %828 = vmatpush3.bf16.msra.mxu1 %v825_v39 }
  0x17   :  { %830 = vmatprep.subr.bf16.mxu1 %v829_v58 }
  0x18   :  { %880 = vperm.xlu1 %863, %v879_v29   ;;  %875 = vperm.xlu0 %862, %v874_v30   ;;  %v841_v29 = vpack.c.bf16 %v558_v27, %v557_v26  ;;  %v560_v30 = vld [vmem:[%s1199_s7 + $0x18] sm:$0xff] }
  0x19   :  { %v845_v31 = vpack.c.bf16 %v560_v30, %v559_v28 }
  0x1a   :  { %832 = vmatpush3.bf16.msra.mxu1 %v829_v58 }
  0x1b   :  { %842 = vmatprep.subr.bf16.mxu1 %v841_v29 }
  0x83   :  { %v73_v40 = vpop.permute.xlu1 %72  ;;  %v67_v41 = vpop.permute.xlu0 %66 }
  0x84   :  { %vm89_vm10 = vcmp.eq.s32.totalorder %v67_v41, 1  ;;  %vm91_vm11 = vcmp.eq.s32.totalorder %v73_v40, 1 }
  0x85   :  { %v97_v42 = vsel %vm89_vm10, %v971_v1, 0.0  ;;  %v99_v45 = vsel %vm91_vm11, %v966_v0, 0.0 }
  0x86   :  { %747 = vmatprep.mubr.msk.f32.mxu0 %vm113_vm9, %v97_v42 }
  0x87   :  { %v76_v43 = vpop.permute.xlu1 %75  ;;  %v70_v44 = vpop.permute.xlu0 %69 }
  0x88   :  { %vm90_vm12 = vcmp.eq.s32.totalorder %v70_v44, 1  ;;  %vm92_vm13 = vcmp.eq.s32.totalorder %v76_v43, 1 }
  0x89   :  { %v98_v46 = vsel %vm90_vm12, %v987_v4, 0.0  ;;  %v100_v49 = vsel %vm92_vm13, %v976_v2, 0.0 }
  0x8a   :  { %748 = vmatmul.mubr.msk.f32.vlgmr.msra.gmra.mrb[0].mxu0 %vm113_vm9, %v98_v46 }
  0x8b   :  { %v82_v47 = vpop.permute.xlu1 %81  ;;  %750 = vmatprep.mubr.msk.f32.mxu0 %vm113_vm9, %v99_v45  ;;  %v79_v48 = vpop.permute.xlu0 %78  ;;  %836 = vmatpush3.bf16.msra.mxu0 %v833_v22  ;;  %v563_v22 = vld [vmem:[%s1199_s7 + $0x30] sm:$0xff]  ;;  %s910_s7 = smov [#allocation2]  }
  0x8c   :  { %vm93_vm14 = vcmp.eq.s32.totalorder %v79_v48, 1  ;;  %vm94_vm15 = vcmp.eq.s32.totalorder %v82_v47, 1  ;;  %838 = vmatprep.subr.bf16.mxu0 %v837_v25  ;;  %v853_v24 = vpack.c.bf16 %v564_v23, %v563_v22  ;;  %s660_s23 = sshll.u32 %s910_s7, 4  ;;  %s661_s23 = int_to_ptr.vmem [resolvable:$true] %s660_s23 }
  0x8d   :  { %v101_v50 = vsel %vm93_vm14, %v1003_v8, 0.0  ;;  %v102_v53 = vsel %vm94_vm15, %v998_v7, 0.0  ;;  %p889_p1 = scmp.lt.s32.totalorder %s661_s23, %s661_s23 }
  0x8e   :  { %751 = vmatmul.mubr.msk.f32.gmra.mrb[2].mxu0 %vm113_vm9, %v100_v49 }
  0x8f   :  { %v88_v51 = vpop.permute.xlu1 %87  ;;  %753 = vmatprep.mubr.msk.f32.mxu0 %vm113_vm9, %v101_v50  ;;  %v85_v52 = vpop.permute.xlu0 %84  ;;  %840 = vmatpush3.bf16.msra.mxu0 %v837_v25  ;;  %v698_v25 = vld [vmem:[%s1198_s6] ss:$0 sm:$0xff]  ;;  %s884_s6 = scalar_lea.vmem %s661_s23, 256 }
  0x90   :  { %vm95_vm0 = vcmp.eq.s32.totalorder %v85_v52, 1  ;;  %vm96_vm1 = vcmp.eq.s32.totalorder %v88_v51, 1  ;;  %p885_p0 = scmp.ne.s32.totalorder %s661_s23, %s884_s6  ;;  %p890_p2 = scmp.lt.s32.totalorder %s884_s6, %s884_s6 }
  0x91   :  { %v103_v54 = vsel %vm95_vm0, %v1025_v12, 0.0  ;;  %v104_v55 = vsel %vm96_vm1, %v1020_v11, 0.0 }
  0x92   :  { %754 = vmatmul.mubr.msk.f32.gmra.mrb[4].mxu0 %vm113_vm9, %v102_v53  ;;  %p891_p3 = por %p890_p2, %p889_p1 }
  0x93   :  { %756 = vmatprep.mubr.msk.f32.mxu0 %vm113_vm9, %v103_v54  ;;  %v866_v36 = vpop.permute.xlu0 %865  ;;  %v871_v37 = vpop.permute.xlu1 %870 }
  0x94   :  { %v872_v42 = vunpack.i.l.bf16 %v871_v37  ;;  %v867_v43 = vunpack.i.l.bf16 %v866_v36  ;;  %v873_v45 = vunpack.i.h.bf16 %v871_v37  ;;  %v868_v50 = vunpack.i.h.bf16 %v866_v36  ;;  %p892_p4 = pnand %p891_p3, %p885_p0 }
  0x96   :  { %757 = vmatmul.mubr.msk.f32.gmra.mrb[6].mxu0 %vm113_vm9, %v104_v55 }
  0x97   :  { %v876_v46 = vpop.permute.xlu0 %875 }
  0x98   :  { %v878_v54 = vunpack.i.h.bf16 %v876_v46  ;;  %v877_v57 = vunpack.i.l.bf16 %v876_v46 }
 0x15d   :  { %v749_v60 = vpop.f32.mrb[0].mxu0 }
 0x15e   :  { %v214_v61 = vadd.f32 %v749_v60, %v679_v59  ;;  %v208_v62 = vpop.f32.mrb[1].mxu0 }
 0x15f   :  { %v209_v63 = vadd.f32 %v679_v59, %v208_v62  ;;  %v881_v62 = vpop.permute.xlu1 %880 }
 0x160   :  { %v248_v2 = vmax.f32 %v214_v61, 0.0 }
 0x161   :  { %v247_v0 = vmax.f32 %v209_v63, 0.0  ;;  %v752_v1 = vpop.f32.mrb[2].mxu0 }
 0x162   :  { %v224_v3 = vadd.f32 %v752_v1, %v679_v59  ;;  %v218_v4 = vpop.f32.mrb[3].mxu0 }
 0x163   :  { %v219_v5 = vadd.f32 %v679_v59, %v218_v4  ;;  %775 = vmatprep.mubr.msk.f32.mxu1 %vm270_vm2, %v247_v0 }
 0x164   :  { %776 = vmatmul.mubr.msk.f32.vlgmr.msra.gmra.mrb[0].mxu1 %vm270_vm2, %v248_v2  ;;  %v250_v8 = vmax.f32 %v224_v3, 0.0 }
 0x165   :  { %v249_v6 = vmax.f32 %v219_v5, 0.0  ;;  %v755_v7 = vpop.f32.mrb[4].mxu0  ;;  %844 = vmatpush3.bf16.msra.mxu1 %v841_v29 }
 0x166   :  { %v234_v9 = vadd.f32 %v755_v7, %v679_v59  ;;  %v228_v10 = vpop.f32.mrb[5].mxu0  ;;  %846 = vmatprep.subr.bf16.mxu1 %v845_v31  ;;  %v883_v7 = vunpack.i.h.bf16 %v881_v62 }
 0x167   :  { %v229_v11 = vadd.f32 %v679_v59, %v228_v10  ;;  %778 = vmatprep.mubr.msk.f32.mxu1 %vm270_vm2, %v249_v6 }
 0x168   :  { %779 = vmatmul.mubr.msk.f32.gmra.mrb[2].mxu1 %vm270_vm2, %v250_v8  ;;  %v252_v14 = vmax.f32 %v234_v9, 0.0 }
 0x169   :  { %v251_v12 = vmax.f32 %v229_v11, 0.0  ;;  %v758_v13 = vpop.f32.mrb[6].mxu0  ;;  %848 = vmatpush3.bf16.msra.mxu1 %v845_v31  ;;  %v882_v11 = vunpack.i.l.bf16 %v881_v62 }
 0x16a   :  { %v244_v15 = vadd.f32 %v758_v13, %v679_v59  ;;  %v238_v16 = vpop.f32.mrb[7].mxu0  ;;  %850 = vmatprep.subr.bf16.mxu1 %v849_v34 }
 0x16b   :  { %v239_v17 = vadd.f32 %v679_v59, %v238_v16  ;;  %781 = vmatprep.mubr.msk.f32.mxu1 %vm270_vm2, %v251_v12 }
 0x16c   :  { %782 = vmatmul.mubr.msk.f32.gmra.mrb[4].mxu1 %vm270_vm2, %v252_v14  ;;  %v254_v19 = vmax.f32 %v244_v15, 0.0 }
 0x16d   :  { %v253_v18 = vmax.f32 %v239_v17, 0.0  ;;  %852 = vmatpush3.bf16.msra.mxu1 %v849_v34 }
 0x16e   :  { %854 = vmatprep.subr.bf16.mxu1 %v853_v24 }
 0x16f   :  { %784 = vmatprep.mubr.msk.f32.mxu1 %vm270_vm2, %v253_v18 }
 0x170   :  { %785 = vmatmul.mubr.msk.f32.gmra.mrb[6].mxu1 %vm270_vm2, %v254_v19 }
 0x171   :  { %856 = vmatpush3.bf16.msra.mxu1 %v853_v24 }
 0x237   :  { %v777_v38 = vpop.f32.mrb[0].mxu1 }
 0x238   :  { %v367_v39 = vadd.f32 %v777_v38, %v689_v35  ;;  %v361_v40 = vpop.f32.mrb[1].mxu1 }
 0x239   :  { %v362_v41 = vadd.f32 %v689_v35, %v361_v40 }
 0x23a   :  { %v441_v47 = vmul.f32 %v872_v42, %v367_v39 }
 0x23b   :  { %v780_v44 = vpop.f32.mrb[2].mxu1  ;;  %v440_v51 = vmul.f32 %v867_v43, %v362_v41 }
 0x23c   :  { %v377_v48 = vadd.f32 %v780_v44, %v689_v35  ;;  %v371_v49 = vpop.f32.mrb[3].mxu1  ;;  %v456_v58 = vsel %vm448_vm3, %v441_v47, 0.0 }
 0x23d   :  { %v372_v52 = vadd.f32 %v689_v35, %v371_v49  ;;  %v449_v63 = vsel %vm448_vm3, %v440_v51, 0.0 }
 0x23e   :  { %v443_v53 = vmul.f32 %v873_v45, %v377_v48 }
 0x23f   :  { %v442_v55 = vmul.f32 %v868_v50, %v372_v52  ;;  %v783_v56 = vpop.f32.mrb[4].mxu1 }
 0x240   :  { %v457_v59 = vsel %vm448_vm3, %v443_v53, 0.0  ;;  %v387_v60 = vadd.f32 %v783_v56, %v689_v35  ;;  %v381_v61 = vpop.f32.mrb[5].mxu1 }
 0x241   :  { %v458_v0 = vadd.f32 %v457_v59, %v456_v58  ;;  %v450_v1 = vsel %vm448_vm3, %v442_v55, 0.0  ;;  %v382_v2 = vadd.f32 %v689_v35, %v381_v61 }
 0x242   :  { %v451_v3 = vadd.f32 %v450_v1, %v449_v63  ;;  %v445_v4 = vmul.f32 %v878_v54, %v387_v60 }
 0x243   :  { %v444_v5 = vmul.f32 %v877_v57, %v382_v2  ;;  %v786_v6 = vpop.f32.mrb[6].mxu1 }
 0x244   :  { %v459_v8 = vsel %vm448_vm3, %v445_v4, 0.0  ;;  %v397_v9 = vadd.f32 %v786_v6, %v689_v35  ;;  %v391_v10 = vpop.f32.mrb[7].mxu1 }
 0x245   :  { %v460_v12 = vadd.f32 %v459_v8, %v458_v0  ;;  %v452_v13 = vsel %vm448_vm3, %v444_v5, 0.0  ;;  %v392_v14 = vadd.f32 %v689_v35, %v391_v10 }
 0x246   :  { %v453_v15 = vadd.f32 %v452_v13, %v451_v3  ;;  %v447_v16 = vmul.f32 %v883_v7, %v397_v9 }
 0x247   :  { %v446_v17 = vmul.f32 %v882_v11, %v392_v14 }
 0x248   :  { %v461_v18 = vsel %vm448_vm3, %v447_v16, 0.0 }
 0x249   :  { %v462_v19 = vadd.f32 %v461_v18, %v460_v12  ;;  %v454_v20 = vsel %vm448_vm3, %v446_v17, 0.0 }
 0x24a   :  { %v455_v21 = vadd.f32 %v454_v20, %v453_v15 }
 0x24c   :  { %795 = vmatprep.mubr.msk.f32.mxu0 %vm448_vm3, %v455_v21 }
 0x24d   :  { %796 = vmatmul.mubr.msk.f32.vlgmr.msra.gmra.mrb[8].mxu0 %vm448_vm3, %v462_v19 }
 0x320   :  { %v797_v26 = vpop.f32.mrb[8].mxu0 }
 0x321   :  { %v552_v27 = vadd.f32 %v797_v26, %v698_v25  ;;  %v546_v28 = vpop.f32.mrb[9].mxu0 }
 0x322   :  { %v547_v29 = vadd.f32 %v698_v25, %v546_v28 }
 0x323   :  { %v556_v31 = vmax.f32 %v552_v27, 0.0 }
 0x324   :  { %v555_v30 = vmax.f32 %v547_v29, 0.0 }
 0x326   :  { %814 = vmatprep.mubr.msk.f32.mxu1 %vm270_vm2, %v555_v30 }
 0x327   :  { %815 = vmatmul.mubr.msk.f32.vlgmr.msra.gmra.mrb[8].mxu1 %vm270_vm2, %v556_v31 }
 0x3fa   :  { %v816_v33 = vpop.f32.mrb[8].mxu1 }
 0x3fb   :  { %v650_v34 = vadd.f32 %v816_v33, %v701_v32  ;;  %v644_v35 = vpop.f32.mrb[9].mxu1 }
 0x3fc   :  { %v645_v36 = vadd.f32 %v701_v32, %v644_v35 }
 0x3fd   :  { %654 = vst.msk [vmem:[#allocation2 + $0x8] sm:$0xff] %vm448_vm3, %v650_v34 }
 0x3fe   :  { %653 = vst.msk [vmem:[#allocation2] sm:$0xff] %vm448_vm3, %v645_v36 }
 0x3ff   :  { %895 = shalt.err (!%p892_p4)
}
 0x400   :  { %s896_s25 = scalar_lea.hbm %s1201_s9, 256 }
 0x401   :  { %p897_p5 = scmp.ne.s32.totalorder %s1201_s9, %s896_s25  ;;  %p900_p6 = scmp.lt.u32.totalorder %s896_s25, %s1201_s9 }
 0x403   :  { %p902_p7 = pnand %p900_p6, %p897_p5 }
 0x405   :  { %905 = shalt.err (!%p902_p7)
}
 0x406   :  { %s911_s28 = smov 128   ;;  %s912_s29 = smov 8  }
 0x407   :  { %666 = dma.vmem_to_hbm [thread:$0]  %s661_s23, 256, %s1201_s9, [#allocation3], %s911_s28, %s911_s28, %s912_s29  }
 0x408   :  { %906 = dma.done.wait [#allocation3], 256  }
 0x409   :  { %907 = vsyncadd [#allocation3], 4294967040 }
 0x40a   :  { %670 = vsyncpa [#allocation3], 1 }

</bundles_post_ra>
